<compile_context>
chip_gen: v5e
topology: v5e:2x2
jax: 0.10.0
libtpu: 0.0.40
codegen_flags: <defaults>
</compile_context>

<pallas_src>
import functools

import jax
import jax.numpy as jnp
from jax import lax
from jax.experimental import pallas as pl
from jax.experimental.pallas import tpu as pltpu

BN_EPS = 1e-5
_LANE = 128
_SUBLANE = 8
_VMEM_LIMIT = 32 * 1024 * 1024   # far above actual use; safe on v5e/v6e/v7x


def _round_up(n, m):
    return (n + m - 1) // m * m


def _cdiv(a, b):
    return (a + b - 1) // b


# ---------------------------------------------------------------------------
# Kernel 1: per-core partial sums / sums-of-squares of the packed input.
# Grid = (n_core, tiles_per_core); axis 0 "parallel" (both TCs on v7x),
# axis 1 "arbitrary" (reduction).  Accumulation is into a full-sublane
# (8, lane_w) block -> no masked partial stores.
# ---------------------------------------------------------------------------
def _bn_stats_kernel(x_ref, sum_ref, sq_ref):
    i = pl.program_id(1)

    @pl.when(i == 0)
    def _init():
        sum_ref[...] = jnp.zeros_like(sum_ref)
        sq_ref[...] = jnp.zeros_like(sq_ref)

    x = x_ref[...]                                    # (tbp, lane_w) f32
    xg = x.reshape(-1, _SUBLANE, x.shape[-1])         # fold rows into 8-sublane groups
    sum_ref[...] += jnp.sum(xg, axis=0)               # (8, lane_w), lane-dense VPU adds
    sq_ref[...] += jnp.sum(xg * xg, axis=0)


# ---------------------------------------------------------------------------
# Kernel 2: block-diagonal, batch-packed MLP forward for one batch tile.
# BatchNorm is already folded into (w1, b1) by the wrapper.
# ---------------------------------------------------------------------------
def _mlp_forward_kernel(w1_ref, b1_ref, rest_ref, x_ref, o_ref, *, cfg):
    bf16 = jnp.bfloat16

    # Layer 1: x_packed @ W1_folded + b1_folded, ReLU.  bf16 MXU inputs,
    # f32 accumulation.
    y = jnp.dot(x_ref[...].astype(bf16), w1_ref[...].astype(bf16),
                preferred_element_type=jnp.float32) + b1_ref[...]
    y = jnp.maximum(y, 0.0)

    # Remaining hidden layers (block-diagonal weights in the resident slab).
    for w_row, b_row, din, dout in cfg["layers"]:
        w = rest_ref[w_row:w_row + din, :dout].astype(bf16)
        b = rest_ref[b_row:b_row + 1, :dout]
        y = jnp.dot(y.astype(bf16), w, preferred_element_type=jnp.float32) + b
        y = jnp.maximum(y, 0.0)

    # Reward head (block-diagonal): each output row holds `pack` samples'
    # rewards along the lane axis; the wrapper reshapes back to (B, reward).
    w_row, b_row, din, dout = cfg["head"]
    w = rest_ref[w_row:w_row + din, :dout].astype(bf16)
    b = rest_ref[b_row:b_row + 1, :dout]
    out = jnp.dot(y.astype(bf16), w, preferred_element_type=jnp.float32) + b
    o_ref[...] = out.astype(o_ref.dtype)


# ---------------------------------------------------------------------------
# Parameter packing: block-diagonal replication + one padded static slab.
# Layer 1 is kept separate so the wrapper can fold the (runtime) BatchNorm
# scale/shift into it without touching the static slab.
# ---------------------------------------------------------------------------
def pack_params(params, input_dims, neuron_dims, reward_dims):
    d_in = int(input_dims)
    reward_dims = int(reward_dims)
    n_hidden = len(neuron_dims)
    # Pack factor: how many samples share one 128-lane row.  Falls back to 1
    # (un-packed, still correct) if the input width doesn't divide 128.
    pack = _LANE // d_in if (_LANE % d_in == 0) else 1

    def bd(w):   # (din, dout) -> block-diagonal (pack*din, pack*dout)
        return jnp.kron(jnp.eye(pack, dtype=jnp.float32),
                        jnp.asarray(w, jnp.float32))

    def tile_row(b):  # (1, dout) -> (1, pack*dout)
        return jnp.tile(jnp.asarray(b, jnp.float32).reshape(1, -1), (1, pack))

    w1_bd = bd(params["w1"])                          # (pack*d_in, pack*h1)
    b1_bd = tile_row(params["b1"])                    # (1, pack*h1)

    widths = [pack * int(h) for h in neuron_dims[1:]] + [pack * reward_dims]
    ncols = max(widths)

    blocks, row = [], 0
    cfg = {"layers": [], "head": None, "pack": pack, "d_in": d_in,
           "reward_dims": reward_dims}

    def add(a):
        nonlocal row
        r0 = row
        rpad = _round_up(a.shape[0], _SUBLANE)
        blk = jnp.zeros((rpad, ncols), jnp.float32)
        blk = blk.at[:a.shape[0], :a.shape[1]].set(a)
        blocks.append(blk)
        row += rpad
        return r0

    for i in range(2, n_hidden + 1):
        w_bd, b_t = bd(params[f"w{i}"]), tile_row(params[f"b{i}"])
        w_row, b_row = add(w_bd), add(b_t)
        cfg["layers"].append((w_row, b_row, int(w_bd.shape[0]), int(w_bd.shape[1])))
    wh_bd, bh_t = bd(params[f"w{n_hidden + 1}"]), tile_row(params[f"b{n_hidden + 1}"])
    w_row, b_row = add(wh_bd), add(bh_t)
    cfg["head"] = (w_row, b_row, int(wh_bd.shape[0]), int(wh_bd.shape[1]))

    packed = {"w1_bd": w1_bd, "b1_bd": b1_bd,
              "rest": jnp.concatenate(blocks, axis=0),
              "gamma": jnp.asarray(params["bn_gamma"], jnp.float32).reshape(-1),
              "beta": jnp.asarray(params["bn_beta"], jnp.float32).reshape(-1)}
    return packed, cfg


# ---------------------------------------------------------------------------
# Wrapper
# ---------------------------------------------------------------------------
def reward_net_forward(x, packed, cfg, *, block_batch=16384):
    """x: (B, input_dims) f32 -> (B, reward_dims) f32."""
    batch, d_in = x.shape
    assert d_in == cfg["d_in"]
    pack, r_dims = cfg["pack"], cfg["reward_dims"]
    lane_w = pack * d_in
    quantum = pack * _SUBLANE        # samples per packed sublane group

    # ---- batch tiling: pad the batch instead of a whole-batch fallback ----
    tb = _round_up(min(batch, block_batch), quantum)     # samples per tile
    n_tiles = _cdiv(batch, tb)
    n_core = 2 if n_tiles >= 2 else 1                    # 2-TC stats split (v7x)
    n_tiles_pad = _round_up(n_tiles, n_core)
    batch_pad = n_tiles_pad * tb
    if batch_pad != batch:
        x = jnp.pad(x, ((0, batch_pad - batch), (0, 0)))  # zero rows: no effect on sums
    xp = x.reshape(batch_pad // pack, lane_w)             # free, contiguous reshape
    tbp, bp = tb // pack, batch_pad // pack
    tiles_per_core = n_tiles_pad // n_core

    # ---- pass 1: global BatchNorm statistics (partial sums per core) ------
    sums, sqs = pl.pallas_call(
        _bn_stats_kernel,
        out_shape=(jax.ShapeDtypeStruct((n_core * _SUBLANE, lane_w), jnp.float32),
                   jax.ShapeDtypeStruct((n_core * _SUBLANE, lane_w), jnp.float32)),
        grid=(n_core, tiles_per_core),
        in_specs=[pl.BlockSpec((tbp, lane_w),
                               lambda c, i: (c * tiles_per_core + i, 0))],
        out_specs=(pl.BlockSpec((_SUBLANE, lane_w), lambda c, i: (c, 0)),
                   pl.BlockSpec((_SUBLANE, lane_w), lambda c, i: (c, 0))),
        compiler_params=pltpu.CompilerParams(
            dimension_semantics=("parallel", "arbitrary"),
            vmem_limit_bytes=_VMEM_LIMIT),
    )(xp)

    # ---- tiny finalize + BN fold in the wrapper (a few KB of XLA work) ----
    # TODO(synk): E[x^2]-E[x]^2 in f32 can lose precision for large-|mean| or
    # huge-batch inputs; a shifted/Welford accumulation would be more robust.
    s = sums.sum(axis=0).reshape(pack, d_in).sum(axis=0)      # (d_in,)
    sq = sqs.sum(axis=0).reshape(pack, d_in).sum(axis=0)
    inv_n = 1.0 / float(batch)
    mean = s * inv_n
    var = jnp.maximum(sq * inv_n - mean * mean, 0.0)           # biased (training)
    rstd = lax.rsqrt(var + BN_EPS)
    scale = rstd * packed["gamma"]
    shift = packed["beta"] - mean * scale
    scale_p = jnp.tile(scale, pack)[:, None]                   # (pack*d_in, 1)
    shift_p = jnp.tile(shift, pack)[None, :]                   # (1, pack*d_in)
    w1f = scale_p * packed["w1_bd"]                            # BN folded into W1
    b1f = shift_p @ packed["w1_bd"] + packed["b1_bd"]          # ... and into b1

    # ---- pass 2: batch-packed MLP, fully parallel over batch tiles --------
    out_p = pl.pallas_call(
        functools.partial(_mlp_forward_kernel, cfg=cfg),
        out_shape=jax.ShapeDtypeStruct((bp, pack * r_dims), jnp.float32),
        grid=(n_tiles_pad,),
        in_specs=[pl.BlockSpec(w1f.shape, lambda i: (0, 0)),            # folded layer 1
                  pl.BlockSpec(b1f.shape, lambda i: (0, 0)),
                  pl.BlockSpec(packed["rest"].shape, lambda i: (0, 0)),  # static slab
                  pl.BlockSpec((tbp, lane_w), lambda i: (i, 0))],        # x tile
        out_specs=pl.BlockSpec((tbp, pack * r_dims), lambda i: (i, 0)),
        compiler_params=pltpu.CompilerParams(
            dimension_semantics=("parallel",),
            vmem_limit_bytes=_VMEM_LIMIT),
    )(w1f, b1f, packed["rest"], xp)

    return out_p.reshape(batch_pad, r_dims)[:batch]


# ---------------------------------------------------------------------------
# Synthetic init + pure-JAX reference
# ---------------------------------------------------------------------------
def init_params(key, state_dims, action_dims, reward_dims, neuron_dims):
    """Mirror the PyTorch module's parameter shapes/init.

    Hidden Linear layers: PyTorch default U(-1/sqrt(fan_in), 1/sqrt(fan_in)).
    Reward head (weight_init): weight ~ U(-0.003, 0.003), bias = 0.
    BatchNorm1d affine: gamma = 1, beta = 0.  Weights stored as (in, out).
    """
    input_dims = state_dims + action_dims
    dims = [input_dims] + list(neuron_dims)

    params = {"bn_gamma": jnp.ones((1, input_dims), jnp.float32),
              "bn_beta": jnp.zeros((1, input_dims), jnp.float32)}
    keys = jax.random.split(key, 2 * len(neuron_dims) + 1)
    ki = 0
    for i, (din, dout) in enumerate(zip(dims[:-1], dims[1:]), start=1):
        lim = 1.0 / float(din) ** 0.5
        params[f"w{i}"] = jax.random.uniform(keys[ki], (din, dout), jnp.float32,
                                             -lim, lim)
        ki += 1
        params[f"b{i}"] = jax.random.uniform(keys[ki], (1, dout), jnp.float32,
                                             -lim, lim)
        ki += 1
    i_last = len(neuron_dims) + 1
    params[f"w{i_last}"] = jax.random.uniform(keys[ki], (dims[-1], reward_dims),
                                              jnp.float32, -0.003, 0.003)
    params[f"b{i_last}"] = jnp.zeros((1, reward_dims), jnp.float32)
    return params


def reference_forward(x, params, neuron_dims):
    """Pure-JAX reference (training-mode BatchNorm1d + MLP), all f32."""
    mean = jnp.mean(x, axis=0, keepdims=True)
    var = jnp.mean((x - mean) ** 2, axis=0, keepdims=True)
    y = (x - mean) / jnp.sqrt(var + BN_EPS)
    y = y * params["bn_gamma"] + params["bn_beta"]
    n_hidden = len(neuron_dims)
    for i in range(1, n_hidden + 1):
        y = jnp.maximum(y @ params[f"w{i}"] + params[f"b{i}"], 0.0)
    return y @ params[f"w{n_hidden + 1}"] + params[f"b{n_hidden + 1}"]


if __name__ == "__main__":
    # Net(state_dims=12, action_dims=4, reward_dims=1, neuron_dims=[32, 32]).
    state_dims, action_dims, reward_dims = 12, 4, 1
    neuron_dims = [32, 32]
    batch = 200          # deliberately NOT a tile multiple: exercises padding path

    key = jax.random.PRNGKey(0)
    k_x, k_p = jax.random.split(key)
    d_in = state_dims + action_dims
    x = jax.random.normal(k_x, (batch, d_in), jnp.float32)
    params = init_params(k_p, state_dims, action_dims, reward_dims, neuron_dims)

    packed, cfg = pack_params(params, d_in, neuron_dims, reward_dims)

    # Small block_batch so the demo exercises a multi-tile grid (2 tiles).
    fwd = jax.jit(functools.partial(reward_net_forward, cfg=cfg, block_batch=128))
    out = jax.block_until_ready(fwd(x, packed))

    ref = reference_forward(x, params, neuron_dims)
    assert out.shape == (batch, reward_dims)
    err = float(jnp.max(jnp.abs(out - ref)))
    # bf16 MXU inputs (f32 accumulation): expect ~1e-4-level absolute error.
    assert err < 2e-3, f"mismatch vs reference: max abs err = {err}"
    print("KERNEL_OK")
</pallas_src>

<mosaic_0001>
module attributes {stable_mosaic.version = 11 : i64} {
  func.func @_bn_stats_kernel(%arg0: i32, %arg1: i32, %arg2: memref<16x128xf32, #tpu.memory_space<vmem>>, %arg3: memref<8x128xf32, #tpu.memory_space<vmem>>, %arg4: memref<8x128xf32, #tpu.memory_space<vmem>>) attributes {dimension_semantics = [#tpu.dimension_semantics<parallel>, #tpu.dimension_semantics<arbitrary>], iteration_bounds = array<i64: 2, 1>, scalar_prefetch = 0 : i64, scratch_operands = 0 : i64, tpu.core_type = #tpu.core_type<tc>, window_params = [{transform_indices = @transform_0, window_bounds = array<i64: 16, 128>}, {transform_indices = @transform_1, window_bounds = array<i64: 8, 128>}, {transform_indices = @transform_2, window_bounds = array<i64: 8, 128>}]} {
    %c0_i32 = arith.constant 0 : i32
    %0 = arith.cmpi eq, %arg1, %c0_i32 : i32
    %1 = arith.extui %0 : i1 to i32
    %c0_i32_0 = arith.constant 0 : i32
    %2 = arith.cmpi ne, %1, %c0_i32_0 : i32
    scf.if %2 {
      %cst_11 = arith.constant 0.000000e+00 : f32
      %14 = vector.broadcast %cst_11 : f32 to vector<8x128xf32>
      %c0_12 = arith.constant 0 : index
      %c0_13 = arith.constant 0 : index
      %15 = vector.load %arg3[%c0_12, %c0_13] : memref<8x128xf32, #tpu.memory_space<vmem>>, vector<8x128xf32>
      tpu.vector_store %arg3[%c0_12, %c0_13], %14 {strides = array<i32>} : memref<8x128xf32, #tpu.memory_space<vmem>>, vector<8x128xf32>,
      %cst_14 = arith.constant 0.000000e+00 : f32
      %16 = vector.broadcast %cst_14 : f32 to vector<8x128xf32>
      %c0_15 = arith.constant 0 : index
      %c0_16 = arith.constant 0 : index
      %17 = vector.load %arg4[%c0_15, %c0_16] : memref<8x128xf32, #tpu.memory_space<vmem>>, vector<8x128xf32>
      tpu.vector_store %arg4[%c0_15, %c0_16], %16 {strides = array<i32>} : memref<8x128xf32, #tpu.memory_space<vmem>>, vector<8x128xf32>,
    } else {
    }
    %c0 = arith.constant 0 : index
    %c0_1 = arith.constant 0 : index
    %3 = vector.load %arg2[%c0, %c0_1] : memref<16x128xf32, #tpu.memory_space<vmem>>, vector<16x128xf32>
    %4 = vector.shape_cast %3 : vector<16x128xf32> to vector<2x8x128xf32>
    %c0_2 = arith.constant 0 : index
    %c0_3 = arith.constant 0 : index
    %5 = vector.load %arg3[%c0_2, %c0_3] : memref<8x128xf32, #tpu.memory_space<vmem>>, vector<8x128xf32>
    %cst = arith.constant dense<0.000000e+00> : vector<8x128xf32>
    %6 = vector.multi_reduction <add>, %4, %cst [0] : vector<2x8x128xf32> to vector<8x128xf32>
    %7 = arith.addf %5, %6 : vector<8x128xf32>
    %c0_4 = arith.constant 0 : index
    %c0_5 = arith.constant 0 : index
    %8 = vector.load %arg3[%c0_4, %c0_5] : memref<8x128xf32, #tpu.memory_space<vmem>>, vector<8x128xf32>
    tpu.vector_store %arg3[%c0_4, %c0_5], %7 {strides = array<i32>} : memref<8x128xf32, #tpu.memory_space<vmem>>, vector<8x128xf32>,
    %c0_6 = arith.constant 0 : index
    %c0_7 = arith.constant 0 : index
    %9 = vector.load %arg4[%c0_6, %c0_7] : memref<8x128xf32, #tpu.memory_space<vmem>>, vector<8x128xf32>
    %10 = arith.mulf %4, %4 : vector<2x8x128xf32>
    %cst_8 = arith.constant dense<0.000000e+00> : vector<8x128xf32>
    %11 = vector.multi_reduction <add>, %10, %cst_8 [0] : vector<2x8x128xf32> to vector<8x128xf32>
    %12 = arith.addf %9, %11 : vector<8x128xf32>
    %c0_9 = arith.constant 0 : index
    %c0_10 = arith.constant 0 : index
    %13 = vector.load %arg4[%c0_9, %c0_10] : memref<8x128xf32, #tpu.memory_space<vmem>>, vector<8x128xf32>
    tpu.vector_store %arg4[%c0_9, %c0_10], %12 {strides = array<i32>} : memref<8x128xf32, #tpu.memory_space<vmem>>, vector<8x128xf32>,
    return
  }
  func.func @transform_0(%arg0: i32, %arg1: i32) -> (i32, i32) {
    %c1_i32 = arith.constant 1 : i32
    %0 = arith.muli %arg0, %c1_i32 : i32
    %1 = arith.addi %0, %arg1 : i32
    %c0_i32 = arith.constant 0 : i32
    %c0_i32_0 = arith.constant 0 : i32
    return %1, %c0_i32 : i32, i32
  }
  func.func @transform_1(%arg0: i32, %arg1: i32) -> (i32, i32) {
    %c0_i32 = arith.constant 0 : i32
    %c0_i32_0 = arith.constant 0 : i32
    return %arg0, %c0_i32 : i32, i32
  }
  func.func @transform_2(%arg0: i32, %arg1: i32) -> (i32, i32) {
    %c0_i32 = arith.constant 0 : i32
    %c0_i32_0 = arith.constant 0 : i32
    return %arg0, %c0_i32 : i32, i32
  }
}

module attributes {stable_mosaic.version = 11 : i64} {
  func.func @_mlp_forward_kernel(%arg0: i32, %arg1: memref<128x256xf32, #tpu.memory_space<vmem>>, %arg2: memref<1x256xf32, #tpu.memory_space<vmem>>, %arg3: memref<528x256xf32, #tpu.memory_space<vmem>>, %arg4: memref<16x128xf32, #tpu.memory_space<vmem>>, %arg5: memref<16x8xf32, #tpu.memory_space<vmem>>) attributes {dimension_semantics = [#tpu.dimension_semantics<parallel>], iteration_bounds = array<i64: 2>, scalar_prefetch = 0 : i64, scratch_operands = 0 : i64, tpu.core_type = #tpu.core_type<tc>, window_params = [{pipeline_mode = #tpu.pipeline_mode<synchronous>, transform_indices = @transform_0, window_bounds = array<i64: 128, 256>}, {pipeline_mode = #tpu.pipeline_mode<synchronous>, transform_indices = @transform_1, window_bounds = array<i64: 1, 256>}, {pipeline_mode = #tpu.pipeline_mode<synchronous>, transform_indices = @transform_2, window_bounds = array<i64: 528, 256>}, {transform_indices = @transform_3, window_bounds = array<i64: 16, 128>}, {transform_indices = @transform_4, window_bounds = array<i64: 16, 8>}]} {
    %c0 = arith.constant 0 : index
    %c0_0 = arith.constant 0 : index
    %0 = vector.load %arg4[%c0, %c0_0] : memref<16x128xf32, #tpu.memory_space<vmem>>, vector<16x128xf32>
    %1 = arith.truncf %0 : vector<16x128xf32> to vector<16x128xbf16>
    %c0_1 = arith.constant 0 : index
    %c0_2 = arith.constant 0 : index
    %2 = vector.load %arg1[%c0_1, %c0_2] : memref<128x256xf32, #tpu.memory_space<vmem>>, vector<128x256xf32>
    %3 = arith.truncf %2 : vector<128x256xf32> to vector<128x256xbf16>
    %cst = arith.constant dense<0.000000e+00> : vector<16x256xf32>
    %4 = tpu.matmul %1, %3, %cst {dimension_numbers = #tpu.dot_dimension_numbers<[1], [0], [0], [1], [0, 0, 1, 1], [], []>} : vector<16x128xbf16>, vector<128x256xbf16>, vector<16x256xf32> -> vector<16x256xf32>
    %c0_3 = arith.constant 0 : index
    %c0_4 = arith.constant 0 : index
    %5 = vector.load %arg2[%c0_3, %c0_4] : memref<1x256xf32, #tpu.memory_space<vmem>>, vector<1x256xf32>
    %6 = vector.broadcast %5 : vector<1x256xf32> to vector<16x256xf32>
    %7 = arith.addf %4, %6 : vector<16x256xf32>
    %cst_5 = arith.constant 0.000000e+00 : f32
    %8 = vector.broadcast %cst_5 : f32 to vector<16x256xf32>
    %9 = arith.maximumf %7, %8 : vector<16x256xf32>
    %c0_6 = arith.constant 0 : index
    %c0_7 = arith.constant 0 : index
    %10 = vector.load %arg3[%c0_6, %c0_7] : memref<528x256xf32, #tpu.memory_space<vmem>>, vector<256x256xf32>
    %11 = arith.truncf %10 : vector<256x256xf32> to vector<256x256xbf16>
    %c256 = arith.constant 256 : index
    %c0_8 = arith.constant 0 : index
    %12 = vector.load %arg3[%c256, %c0_8] : memref<528x256xf32, #tpu.memory_space<vmem>>, vector<1x256xf32>
    %13 = arith.truncf %9 : vector<16x256xf32> to vector<16x256xbf16>
    %cst_9 = arith.constant dense<0.000000e+00> : vector<16x256xf32>
    %14 = tpu.matmul %13, %11, %cst_9 {dimension_numbers = #tpu.dot_dimension_numbers<[1], [0], [0], [1], [0, 0, 1, 1], [], []>} : vector<16x256xbf16>, vector<256x256xbf16>, vector<16x256xf32> -> vector<16x256xf32>
    %15 = vector.broadcast %12 : vector<1x256xf32> to vector<16x256xf32>
    %16 = arith.addf %14, %15 : vector<16x256xf32>
    %cst_10 = arith.constant 0.000000e+00 : f32
    %17 = vector.broadcast %cst_10 : f32 to vector<16x256xf32>
    %18 = arith.maximumf %16, %17 : vector<16x256xf32>
    %c264 = arith.constant 264 : index
    %c0_11 = arith.constant 0 : index
    %19 = vector.load %arg3[%c264, %c0_11] : memref<528x256xf32, #tpu.memory_space<vmem>>, vector<256x8xf32>
    %20 = arith.truncf %19 : vector<256x8xf32> to vector<256x8xbf16>
    %c520 = arith.constant 520 : index
    %c0_12 = arith.constant 0 : index
    %21 = vector.load %arg3[%c520, %c0_12] : memref<528x256xf32, #tpu.memory_space<vmem>>, vector<1x8xf32>
    %22 = arith.truncf %18 : vector<16x256xf32> to vector<16x256xbf16>
    %cst_13 = arith.constant dense<0.000000e+00> : vector<16x8xf32>
    %23 = tpu.matmul %22, %20, %cst_13 {dimension_numbers = #tpu.dot_dimension_numbers<[1], [0], [0], [1], [0, 0, 1, 1], [], []>} : vector<16x256xbf16>, vector<256x8xbf16>, vector<16x8xf32> -> vector<16x8xf32>
    %24 = vector.broadcast %21 : vector<1x8xf32> to vector<16x8xf32>
    %25 = arith.addf %23, %24 : vector<16x8xf32>
    %c0_14 = arith.constant 0 : index
    %c0_15 = arith.constant 0 : index
    %26 = vector.load %arg5[%c0_14, %c0_15] : memref<16x8xf32, #tpu.memory_space<vmem>>, vector<16x8xf32>
    tpu.vector_store %arg5[%c0_14, %c0_15], %25 {strides = array<i32>} : memref<16x8xf32, #tpu.memory_space<vmem>>, vector<16x8xf32>,
    return
  }
  func.func @transform_0(%arg0: i32) -> (i32, i32) {
    %c0_i32 = arith.constant 0 : i32
    %c0_i32_0 = arith.constant 0 : i32
    %c0_i32_1 = arith.constant 0 : i32
    return %c0_i32, %c0_i32_0 : i32, i32
  }
  func.func @transform_1(%arg0: i32) -> (i32, i32) {
    %c0_i32 = arith.constant 0 : i32
    %c0_i32_0 = arith.constant 0 : i32
    %c0_i32_1 = arith.constant 0 : i32
    return %c0_i32, %c0_i32_0 : i32, i32
  }
  func.func @transform_2(%arg0: i32) -> (i32, i32) {
    %c0_i32 = arith.constant 0 : i32
    %c0_i32_0 = arith.constant 0 : i32
    %c0_i32_1 = arith.constant 0 : i32
    return %c0_i32, %c0_i32_0 : i32, i32
  }
  func.func @transform_3(%arg0: i32) -> (i32, i32) {
    %c0_i32 = arith.constant 0 : i32
    %c0_i32_0 = arith.constant 0 : i32
    return %arg0, %c0_i32 : i32, i32
  }
  func.func @transform_4(%arg0: i32) -> (i32, i32) {
    %c0_i32 = arith.constant 0 : i32
    %c0_i32_0 = arith.constant 0 : i32
    return %arg0, %c0_i32 : i32, i32
  }
}

</mosaic_0001>

<bundles_post_ra>
// kernel: tile.18
= control target key start
LH: loop header
LB: loop body
LE: loop exit
PB: predicated region body
PF: predicated region fallthrough
CT: control target
= control target key end

     0   :  { %s22_s0 = inlined_call_operand.vmem [shape: f32[16], index: 0, kind: input, shape index: {}]   ;;  %s23_s1 = inlined_call_operand.vmem [shape: f32[8,16], index: 1, kind: output, shape index: {}]  }
   0x1   :  { %v4_v0 = vld [vmem:[%s22_s0] ss:$0 sm:$0xff] }
   0x2   :  { %5 = vst [vmem:[%s23_s1] sm:$0xff] %v4_v0 }

// kernel: reward_net_forward.2
= control target key start
LH: loop header
LB: loop body
LE: loop exit
PB: predicated region body
PF: predicated region fallthrough
CT: control target
= control target key end

     0   :  { %s359_s9 = smov 0   ;;  %s361_s10 = smov 0   ;;  %s392_s0 = inlined_call_operand.vmem [shape: f32[32,128], index: 0, kind: input, shape index: {}]   ;;  %s393_s1 = inlined_call_operand.vmem [shape: f32[16,128], index: 1, kind: output, shape index: {0}]   ;;  %s394_s2 = inlined_call_operand.vmem [shape: f32[16,128], index: 2, kind: output, shape index: {1}]  }
   0x1   :  { %s363_s11 = smov 0  }
   0x2 LB: > { %s25_s12 = sadd.s32 1, %s338_s10  ;;  %p288_p0 = scmp.ge.s32.totalorder %s342_s11, 1  ;;  %s342_s11 = sphi %s363_s11, %s13_s11   ;;  %s338_s10 = sphi %s361_s10, %s396_s10   ;;  %s334_s9 = sphi %s359_s9, %s395_s9  }
   0x3   : > { %p27_p1 = scmp.ge.s32.totalorder %s25_s12, 2  ;;  %p132_p2 = scmp.lt.s32.totalorder %s342_s11, 3 }
   0x5   : > { %s398_s12 = smov (%p27_p1, %s25_s12), 0  ;;  %p133_p3 = pnand %p288_p0, %p132_p2 }
   0x6   : > { %p166_p4 = scmp.lt.s32.totalorder (!%p133_p3), %s334_s9, 1  ;;  %s289_s13 = sshll.u32 (!%p133_p3), %s334_s9, 1 }
   0x7   : > { %136 = sbr.rel (%p133_p3) target bundleno = 21 (0x15), region = 24  ;;  %p160_p5 = scmp.lt.s32.totalorder (!%p133_p3), %s289_s13, 3 }
   0xc   : > { %s400_s9 = smov (!%p166_p4, %s334_s9), 1  ;;  %s402_s13 = smov (!%p160_p5, %s289_s13), 3 }
   0xd   : > { %s290_s14 = sshll.u32 %s402_s13, 3  ;;  %s291_s15 = sshll.u32 %s400_s9, 3 }
   0xe   : > { %s163_s18 = scalar_lea.vmem %s392_s0, %s290_s14  ;;  %s169_s21 = scalar_lea.vmem %s393_s1, %s291_s15 }
   0xf   : > { %v180_v0 = vld [vmem:[%s163_s18] sm:$0xff]  ;;  %v181_v1 = vld [vmem:[%s163_s18 + $0x8] sm:$0xff]  ;;  %s173_s24 = scalar_lea.vmem %s394_s2, %s291_s15 }
  0x10   : > { %v183_v2 = vadd.f32 %v181_v1, %v180_v0  ;;  %v187_v3 = vmul.f32 %v180_v0, %v180_v0  ;;  %v188_v4 = vmul.f32 %v181_v1, %v181_v1 }
  0x12   : > { %v189_v5 = vadd.f32 %v188_v4, %v187_v3  ;;  %185 = vst [vmem:[%s169_s21] sm:$0xff] %v183_v2 }
  0x14   : > { %191 = vst [vmem:[%s173_s24] sm:$0xff] %v189_v5 }
  0x15 PF: > { %s13_s11 = sadd.s32 1, %s342_s11   ;;  %s395_s9 = smov %s338_s10 }
  0x16   : > { %p10_p6 = scmp.ge.s32.totalorder %s13_s11, 4   ;;  %s396_s10 = smov %s398_s12 }
  0x18   :  { %12 = sbr.rel (!%p10_p6) target bundleno = 2 (0x2), region = 70 }

// kernel: reward_net_forward.3
= control target key start
LH: loop header
LB: loop body
LE: loop exit
PB: predicated region body
PF: predicated region fallthrough
CT: control target
= control target key end

     0   :  { %9 = vsyncpa [#allocation3], 0  ;;  %s726_s15 = smov 0   ;;  %s862_s0 = inlined_call_operand.vmem [shape: f32[128,256], index: 0, kind: input, shape index: {}]   ;;  %s863_s1 = inlined_call_operand.vmem [shape: f32[1,256], index: 1, kind: input, shape index: {}]   ;;  %s864_s2 = inlined_call_operand.hbm [shape: f32[528,256], index: 2, kind: input, shape index: {}]   ;;  %s865_s3 = inlined_call_operand.vmem [shape: f32[32,128], index: 3, kind: input, shape index: {}]   ;;  %s866_s4 = inlined_call_operand.vmem [shape: f32[32,8], index: 4, kind: output, shape index: {}]  }
   0x1 LB: > { %s152_s18 = sshll.u32 %s864_s2, 4  ;;  %s622_s19 = sadd.s32 4294967295, %s696_s15   ;;  %s696_s15 = sphi %s726_s15, %s15_s15   ;;  %s153_s18 = int_to_ptr.hbm [resolvable:$true] %s152_s18 }
   0x2   : > { %p624_p0 = scmp.ge.s32.totalorder %s696_s15, 1  ;;  %p135_p1 = scmp.lt.s32.totalorder %s696_s15, 3 }
   0x3   : > { %p643_p2 = scmp.eq.s32.totalorder %s622_s19, 0  ;;  %s698_s20 = smov [#allocation2]  }
   0x4   : > { %p136_p3 = pnand %p624_p0, %p135_p1  ;;  %s154_s21 = sshll.u32 %s698_s20, 4  ;;  %s155_s21 = int_to_ptr.vmem [resolvable:$true] %s154_s21 }
   0x5   : > { %s699_s22 = smov 256   ;;  %s700_s23 = smov 16  }
   0x6   : > { %p639_p4 = pneg %p136_p3  ;;  %179 = sbr.rel (%p136_p3) target bundleno = 479 (0x1df), region = 36 }
   0x8   : > { %p640_p5 = pnand %p643_p2, %p639_p4 }
   0xa   : > { %642 = dma.hbm_to_vmem [thread:$0]  (!%p640_p5), %s153_s18, 16896, %s155_s21, [#allocation3], %s699_s22, %s699_s22, %s700_s23  }
   0xb   : > { %691 = dma.done.wait (%p643_p2), [#allocation3], 16896  }
   0xc   : > { %693 = vsyncadd (%p643_p2), [#allocation3], 4294950400  ;;  %v249_v0 = vld [vmem:[%s862_s0 + $0xe0] sm:$0xff]  ;;  %v251_v1 = vld [vmem:[%s862_s0 + $0xf0] sm:$0xff]  ;;  %s789_s6 = sshll.u32 %s622_s19, 1  ;;  %vm551_vm0 = vcmask 64512  }
   0xd   : > { %v250_v2 = vld [vmem:[%s862_s0 + $0xe8] sm:$0xff]  ;;  %v267_v3 = vpack.c.bf16 %v251_v1, %v249_v0  ;;  %v252_v4 = vld [vmem:[%s862_s0 + $0xf8] sm:$0xff]  ;;  %v245_v5 = vld [vmem:[%s862_s0 + $0xc0] sm:$0xff]  ;;  %p207_p6 = scmp.lt.s32.totalorder %s789_s6, 3 }
   0xe   : > { %v247_v6 = vld [vmem:[%s862_s0 + $0xd0] sm:$0xff]  ;;  %v268_v7 = vpack.c.bf16 %v252_v4, %v250_v2  ;;  %v246_v8 = vld [vmem:[%s862_s0 + $0xc8] sm:$0xff]  ;;  %v248_v9 = vld [vmem:[%s862_s0 + $0xd8] sm:$0xff] }
   0xf   : > { %275 = vmatpush.bf16.msra.mxu0 %v267_v3  ;;  %v265_v10 = vpack.c.bf16 %v247_v6, %v245_v5  ;;  %v266_v11 = vpack.c.bf16 %v248_v9, %v246_v8  ;;  %v241_v12 = vld [vmem:[%s862_s0 + $0xa0] sm:$0xff]  ;;  %v243_v13 = vld [vmem:[%s862_s0 + $0xb0] sm:$0xff]  ;;  %v242_v14 = vld [vmem:[%s862_s0 + $0xa8] sm:$0xff]  ;;  %s868_s6 = smov (!%p207_p6, %s789_s6), 3 }
  0x10   : > { %289 = vmatpush.bf16.msra.mxu1 %v268_v7  ;;  %v244_v15 = vld [vmem:[%s862_s0 + $0xb8] sm:$0xff]  ;;  %v263_v16 = vpack.c.bf16 %v243_v13, %v241_v12  ;;  %v237_v18 = vld [vmem:[%s862_s0 + $0x80] sm:$0xff]  ;;  %v239_v19 = vld [vmem:[%s862_s0 + $0x90] sm:$0xff]  ;;  %s630_s7 = sshll.u32 %s868_s6, 3 }
  0x11   : > { %v264_v17 = vpack.c.bf16 %v244_v15, %v242_v14  ;;  %v238_v20 = vld [vmem:[%s862_s0 + $0x88] sm:$0xff]  ;;  %v240_v21 = vld [vmem:[%s862_s0 + $0x98] sm:$0xff]  ;;  %v261_v22 = vpack.c.bf16 %v239_v19, %v237_v18  ;;  %v233_v23 = vld [vmem:[%s862_s0 + $0x60] sm:$0xff]  ;;  %s210_s16 = scalar_lea.vmem %s865_s3, %s630_s7  ;;  %s216_s24 = scalar_lea.vmem %s866_s4, %s630_s7 }
  0x12   : > { %v335_v24 = vld [vmem:[#allocation2 + $0xe0] sm:$0xff]  ;;  %v337_v25 = vld [vmem:[#allocation2 + $0xf0] sm:$0xff]  ;;  %v262_v26 = vpack.c.bf16 %v240_v21, %v238_v20  ;;  %v234_v31 = vld [vmem:[%s862_s0 + $0x68] sm:$0xff] }
  0x13   : > { %276 = vmatpush.bf16.msra.mxu0 %v265_v10  ;;  %v235_v27 = vld [vmem:[%s862_s0 + $0x70] sm:$0xff]  ;;  %v385_v28 = vpack.c.bf16 %v337_v25, %v335_v24  ;;  %v367_v29 = vld [vmem:[#allocation2 + $0x1e0] sm:$0xff]  ;;  %v236_v32 = vld [vmem:[%s862_s0 + $0x78] sm:$0xff] }
  0x14   : > { %290 = vmatpush.bf16.msra.mxu1 %v266_v11  ;;  %v369_v30 = vld [vmem:[#allocation2 + $0x1f0] sm:$0xff]  ;;  %v331_v34 = vld [vmem:[#allocation2 + $0xc0] sm:$0xff]  ;;  %v259_v37 = vpack.c.bf16 %v235_v27, %v233_v23  ;;  %v260_v42 = vpack.c.bf16 %v236_v32, %v234_v31  ;;  %v230_v43 = vld [vmem:[%s862_s0 + $0x48] sm:$0xff] }
  0x15   : > { %v401_v33 = vpack.c.bf16 %v369_v30, %v367_v29  ;;  %412 = vmatpush.bf16.msra.mxu2 %v385_v28  ;;  %v333_v35 = vld [vmem:[#allocation2 + $0xd0] sm:$0xff]  ;;  %v363_v36 = vld [vmem:[#allocation2 + $0x1c0] sm:$0xff]  ;;  %v232_v44 = vld [vmem:[%s862_s0 + $0x58] sm:$0xff] }
  0x16   : > { %v229_v38 = vld [vmem:[%s862_s0 + $0x40] sm:$0xff]  ;;  %v231_v39 = vld [vmem:[%s862_s0 + $0x50] sm:$0xff]  ;;  %v383_v40 = vpack.c.bf16 %v333_v35, %v331_v34  ;;  %v258_v56 = vpack.c.bf16 %v232_v44, %v230_v43  ;;  %v226_v60 = vld [vmem:[%s862_s0 + $0x28] sm:$0xff] }
  0x17   : > { %277 = vmatpush.bf16.msra.mxu0 %v263_v16  ;;  %426 = vmatpush.bf16.msra.mxu3 %v401_v33  ;;  %v365_v41 = vld [vmem:[#allocation2 + $0x1d0] sm:$0xff]  ;;  %v327_v46 = vld [vmem:[#allocation2 + $0xa0] sm:$0xff]  ;;  %v257_v51 = vpack.c.bf16 %v231_v39, %v229_v38  ;;  %v228_v61 = vld [vmem:[%s862_s0 + $0x38] sm:$0xff] }
  0x18   : > { %291 = vmatpush.bf16.msra.mxu1 %v264_v17  ;;  %v399_v45 = vpack.c.bf16 %v365_v41, %v363_v36  ;;  %v329_v47 = vld [vmem:[#allocation2 + $0xb0] sm:$0xff]  ;;  %v359_v48 = vld [vmem:[#allocation2 + $0x1a0] sm:$0xff]  ;;  %v256_v1 = vpack.c.bf16 %v228_v61, %v226_v60  ;;  %v222_v4 = vld [vmem:[%s862_s0 + $0x8] sm:$0xff] }
  0x19   : > { %v361_v49 = vld [vmem:[#allocation2 + $0x1b0] sm:$0xff]  ;;  %413 = vmatpush.bf16.msra.mxu2 %v383_v40  ;;  %v381_v50 = vpack.c.bf16 %v329_v47, %v327_v46  ;;  %v225_v52 = vld [vmem:[%s862_s0 + $0x20] sm:$0xff]  ;;  %v224_v5 = vld [vmem:[%s862_s0 + $0x18] sm:$0xff] }
  0x1a   : > { %v397_v53 = vpack.c.bf16 %v361_v49, %v359_v48  ;;  %v323_v54 = vld [vmem:[#allocation2 + $0x80] sm:$0xff]  ;;  %v325_v55 = vld [vmem:[#allocation2 + $0x90] sm:$0xff]  ;;  %v336_v6 = vld [vmem:[#allocation2 + $0xe8] sm:$0xff]  ;;  %v254_v13 = vpack.c.bf16 %v224_v5, %v222_v4 }
  0x1b   : > { %278 = vmatpush.bf16.msra.mxu0 %v261_v22  ;;  %427 = vmatpush.bf16.msra.mxu3 %v399_v45  ;;  %v227_v57 = vld [vmem:[%s862_s0 + $0x30] sm:$0xff]  ;;  %v355_v58 = vld [vmem:[#allocation2 + $0x180] sm:$0xff]  ;;  %v379_v62 = vpack.c.bf16 %v325_v55, %v323_v54  ;;  %v338_v7 = vld [vmem:[#allocation2 + $0xf8] sm:$0xff] }
  0x1c   : > { %292 = vmatpush.bf16.msra.mxu1 %v262_v26  ;;  %v357_v59 = vld [vmem:[#allocation2 + $0x190] sm:$0xff]  ;;  %v255_v63 = vpack.c.bf16 %v227_v57, %v225_v52  ;;  %v221_v2 = vld [vmem:[%s862_s0] sm:$0xff]  ;;  %v368_v8 = vld [vmem:[#allocation2 + $0x1e8] sm:$0xff]  ;;  %v386_v14 = vpack.c.bf16 %v338_v7, %v336_v6 }
  0x1d   : > { %414 = vmatpush.bf16.msra.mxu2 %v381_v50  ;;  %v395_v0 = vpack.c.bf16 %v357_v59, %v355_v58  ;;  %v223_v3 = vld [vmem:[%s862_s0 + $0x10] sm:$0xff]  ;;  %v370_v9 = vld [vmem:[#allocation2 + $0x1f8] sm:$0xff]  ;;  %v218_v11 = vld [vmem:[%s210_s16] sm:$0xff] }
  0x1e   : > { %v253_v10 = vpack.c.bf16 %v223_v3, %v221_v2  ;;  %v219_v12 = vld [vmem:[%s210_s16 + $0x8] sm:$0xff]  ;;  %v402_v15 = vpack.c.bf16 %v370_v9, %v368_v8  ;;  %v334_v17 = vld [vmem:[#allocation2 + $0xd8] sm:$0xff]  ;;  %v319_v35 = vld [vmem:[#allocation2 + $0x60] sm:$0xff] }
  0x1f   : > { %279 = vmatpush.bf16.msra.mxu0 %v259_v37  ;;  %428 = vmatpush.bf16.msra.mxu3 %v397_v53  ;;  %v332_v16 = vld [vmem:[#allocation2 + $0xc8] sm:$0xff]  ;;  %v220_v18 = vpack.c.bf16 %v219_v12, %v218_v11  ;;  %v366_v20 = vld [vmem:[#allocation2 + $0x1d8] sm:$0xff]  ;;  %v321_v36 = vld [vmem:[#allocation2 + $0x70] sm:$0xff] }
  0x20   : > { %293 = vmatpush.bf16.msra.mxu1 %v260_v42  ;;  %v364_v19 = vld [vmem:[#allocation2 + $0x1c8] sm:$0xff]  ;;  %v384_v21 = vpack.c.bf16 %v334_v17, %v332_v16  ;;  %v330_v24 = vld [vmem:[#allocation2 + $0xb8] sm:$0xff]  ;;  %v351_v37 = vld [vmem:[#allocation2 + $0x160] sm:$0xff]  ;;  %v377_v38 = vpack.c.bf16 %v321_v36, %v319_v35 }
  0x21   : > { %415 = vmatpush.bf16.msra.mxu2 %v379_v62  ;;  %v400_v22 = vpack.c.bf16 %v366_v20, %v364_v19  ;;  %v328_v23 = vld [vmem:[#allocation2 + $0xa8] sm:$0xff]  ;;  %v362_v26 = vld [vmem:[#allocation2 + $0x1b8] sm:$0xff]  ;;  %v353_v39 = vld [vmem:[#allocation2 + $0x170] sm:$0xff] }
  0x22   : > { %v360_v25 = vld [vmem:[#allocation2 + $0x1a8] sm:$0xff]  ;;  %v382_v27 = vpack.c.bf16 %v330_v24, %v328_v23  ;;  %v326_v30 = vld [vmem:[#allocation2 + $0x98] sm:$0xff]  ;;  %v393_v42 = vpack.c.bf16 %v353_v39, %v351_v37  ;;  %v315_v47 = vld [vmem:[#allocation2 + $0x40] sm:$0xff] }
  0x23   : > { %280 = vmatpush.bf16.msra.mxu0 %v257_v51  ;;  %429 = vmatpush.bf16.msra.mxu3 %v395_v0  ;;  %v398_v28 = vpack.c.bf16 %v362_v26, %v360_v25  ;;  %v324_v29 = vld [vmem:[#allocation2 + $0x88] sm:$0xff]  ;;  %v358_v32 = vld [vmem:[#allocation2 + $0x198] sm:$0xff]  ;;  %v317_v48 = vld [vmem:[#allocation2 + $0x50] sm:$0xff] }
  0x24   : > { %294 = vmatpush.bf16.msra.mxu1 %v258_v56  ;;  %v356_v31 = vld [vmem:[#allocation2 + $0x188] sm:$0xff]  ;;  %v380_v33 = vpack.c.bf16 %v326_v30, %v324_v29  ;;  %v322_v41 = vld [vmem:[#allocation2 + $0x78] sm:$0xff]  ;;  %v347_v49 = vld [vmem:[#allocation2 + $0x140] sm:$0xff]  ;;  %v375_v50 = vpack.c.bf16 %v317_v48, %v315_v47 }
  0x25   : > { %v396_v34 = vpack.c.bf16 %v358_v32, %v356_v31  ;;  %v320_v40 = vld [vmem:[#allocation2 + $0x68] sm:$0xff]  ;;  %v354_v45 = vld [vmem:[#allocation2 + $0x178] sm:$0xff]  ;;  %416 = vmatpush.bf16.msra.mxu2 %v377_v38  ;;  %v349_v51 = vld [vmem:[#allocation2 + $0x150] sm:$0xff] }
  0x26   : > { %v378_v43 = vpack.c.bf16 %v322_v41, %v320_v40  ;;  %v352_v44 = vld [vmem:[#allocation2 + $0x168] sm:$0xff]  ;;  %v318_v53 = vld [vmem:[#allocation2 + $0x58] sm:$0xff]  ;;  %v391_v54 = vpack.c.bf16 %v349_v51, %v347_v49  ;;  %v311_v59 = vld [vmem:[#allocation2 + $0x20] sm:$0xff] }
  0x27   : > { %281 = vmatpush.bf16.msra.mxu0 %v255_v63  ;;  %v394_v46 = vpack.c.bf16 %v354_v45, %v352_v44  ;;  %430 = vmatpush.bf16.msra.mxu3 %v393_v42  ;;  %v316_v52 = vld [vmem:[#allocation2 + $0x48] sm:$0xff]  ;;  %v350_v57 = vld [vmem:[#allocation2 + $0x158] sm:$0xff]  ;;  %v313_v60 = vld [vmem:[#allocation2 + $0x30] sm:$0xff] }
  0x28   : > { %295 = vmatpush.bf16.msra.mxu1 %v256_v1  ;;  %v376_v55 = vpack.c.bf16 %v318_v53, %v316_v52  ;;  %v348_v56 = vld [vmem:[#allocation2 + $0x148] sm:$0xff]  ;;  %v343_v61 = vld [vmem:[#allocation2 + $0x120] sm:$0xff]  ;;  %v373_v62 = vpack.c.bf16 %v313_v60, %v311_v59  ;;  %v345_v63 = vld [vmem:[#allocation2 + $0x130] sm:$0xff] }
  0x29   : > { %417 = vmatpush.bf16.msra.mxu2 %v375_v50  ;;  %v392_v58 = vpack.c.bf16 %v350_v57, %v348_v56  ;;  %v312_v0 = vld [vmem:[#allocation2 + $0x28] sm:$0xff]  ;;  %v314_v1 = vld [vmem:[#allocation2 + $0x38] sm:$0xff]  ;;  %v389_v2 = vpack.c.bf16 %v345_v63, %v343_v61  ;;  %v307_v7 = vld [vmem:[#allocation2] sm:$0xff] }
  0x2a   : > { %v374_v3 = vpack.c.bf16 %v314_v1, %v312_v0  ;;  %v344_v4 = vld [vmem:[#allocation2 + $0x128] sm:$0xff]  ;;  %v346_v5 = vld [vmem:[#allocation2 + $0x138] sm:$0xff]  ;;  %v309_v8 = vld [vmem:[#allocation2 + $0x10] sm:$0xff] }
  0x2b   : > { %282 = vmatpush.bf16.msra.mxu0 %v253_v10  ;;  %431 = vmatpush.bf16.msra.mxu3 %v391_v54  ;;  %v390_v6 = vpack.c.bf16 %v346_v5, %v344_v4  ;;  %v339_v9 = vld [vmem:[#allocation2 + $0x100] sm:$0xff]  ;;  %v371_v10 = vpack.c.bf16 %v309_v8, %v307_v7  ;;  %v341_v11 = vld [vmem:[#allocation2 + $0x110] sm:$0xff]  ;;  %v308_v12 = vld [vmem:[#allocation2 + $0x8] sm:$0xff] }
  0x2c   : > { %296 = vmatpush.bf16.msra.mxu1 %v254_v13  ;;  %v310_v13 = vld [vmem:[#allocation2 + $0x18] sm:$0xff]  ;;  %v340_v16 = vld [vmem:[#allocation2 + $0x108] sm:$0xff]  ;;  %v502_v19 = vld [vmem:[#allocation2 + $0x3f0] sm:$0xff] }
  0x2d   : > { %418 = vmatpush.bf16.msra.mxu2 %v373_v62  ;;  %v342_v17 = vld [vmem:[#allocation2 + $0x118] sm:$0xff]  ;;  %v503_v20 = vld [vmem:[#allocation2 + $0x400] sm:$0xff]  ;;  %v486_v24 = vld [vmem:[#allocation2 + $0x2f0] sm:$0xff] }
  0x2e   : > { %283 = vmatmul.bf16.vlgmr.msra.gmra.mxu0 %v220_v18  ;;  %v501_v23 = vld [vmem:[#allocation2 + $0x3e0] sm:$0xff]  ;;  %v498_v30 = vld [vmem:[#allocation2 + $0x3b0] sm:$0xff] }
  0x2f   : > { %440 = vmatpush.bf16.msrb.mxu0 %v386_v14  ;;  %297 = vmatmul.bf16.vlgmr.msra.gmra.mxu1 %v220_v18  ;;  %v387_v14 = vpack.c.bf16 %v341_v11, %v339_v9  ;;  %v388_v18 = vpack.c.bf16 %v342_v17, %v340_v16  ;;  %v487_v25 = vld [vmem:[#allocation2 + $0x300] sm:$0xff]  ;;  %v482_v54 = vld [vmem:[#allocation2 + $0x2b0] sm:$0xff] }
  0x30   : > { %454 = vmatpush.bf16.msrb.mxu1 %v402_v15  ;;  %432 = vmatpush.bf16.msra.mxu3 %v389_v2  ;;  %v372_v15 = vpack.c.bf16 %v310_v13, %v308_v12  ;;  %v511_v26 = vpack.c.bf16 %v487_v25, %v486_v24  ;;  %v485_v29 = vld [vmem:[#allocation2 + $0x2e0] sm:$0xff]  ;;  %v494_v57 = vld [vmem:[#allocation2 + $0x370] sm:$0xff] }
  0x31   : > { %419 = vmatpush.bf16.msra.mxu2 %v371_v10  ;;  %v499_v31 = vld [vmem:[#allocation2 + $0x3c0] sm:$0xff]  ;;  %v480_v60 = vld [vmem:[#allocation2 + $0x290] sm:$0xff] }
  0x32   : > { %v497_v35 = vld [vmem:[#allocation2 + $0x3a0] sm:$0xff]  ;;  %v492_v63 = vld [vmem:[#allocation2 + $0x350] sm:$0xff] }
  0x33   : > { %441 = vmatpush.bf16.msrb.mxu0 %v384_v21  ;;  %v500_v21 = vld [vmem:[#allocation2 + $0x3d0] sm:$0xff]  ;;  %v269_v37 = vld [vmem:[%s863_s1] sm:$0x3] }
  0x34   : > { %455 = vmatpush.bf16.msrb.mxu1 %v400_v22  ;;  %433 = vmatpush.bf16.msra.mxu3 %v387_v14  ;;  %v519_v22 = vpack.c.bf16 %v503_v20, %v502_v19  ;;  %v271_v40 = vperm.slane %v269_v37, 0  ;;  %v272_v41 = vperm.slane %v269_v37, 1  ;;  %v481_v61 = vld [vmem:[#allocation2 + $0x2a0] sm:$0xff]  ;;  %v478_v2 = vld [vmem:[#allocation2 + $0x270] sm:$0xff] }
  0x35   : > { %523 = vmatpush.bf16.msrb.mxu2 %v511_v26  ;;  %v508_v62 = vpack.c.bf16 %v481_v61, %v480_v60  ;;  %v493_v0 = vld [vmem:[#allocation2 + $0x360] sm:$0xff]  ;;  %v490_v5 = vld [vmem:[#allocation2 + $0x330] sm:$0xff] }
  0x36   : > { %v514_v1 = vpack.c.bf16 %v493_v0, %v492_v63  ;;  %v476_v8 = vld [vmem:[#allocation2 + $0x250] sm:$0xff]  ;;  %v477_v9 = vld [vmem:[#allocation2 + $0x260] sm:$0xff] }
  0x37   : > { %442 = vmatpush.bf16.msrb.mxu0 %v382_v27  ;;  %v484_v27 = vld [vmem:[#allocation2 + $0x2d0] sm:$0xff]  ;;  %v506_v10 = vpack.c.bf16 %v477_v9, %v476_v8  ;;  %v489_v12 = vld [vmem:[#allocation2 + $0x320] sm:$0xff] }
  0x38   : > { %456 = vmatpush.bf16.msrb.mxu1 %v398_v28  ;;  %537 = vmatpush.bf16.msrb.mxu3 %v519_v22  ;;  %v518_v28 = vpack.c.bf16 %v501_v23, %v500_v21  ;;  %v510_v32 = vpack.c.bf16 %v485_v29, %v484_v27  ;;  %v488_v11 = vld [vmem:[#allocation2 + $0x310] sm:$0xff]  ;;  %v404_v20 = vld [vmem:[#allocation2 + $0x200] ss:$8 sm:$0x3] }
  0x39   : > { %v512_v13 = vpack.c.bf16 %v489_v12, %v488_v11  ;;  %v474_v14 = vld [vmem:[#allocation2 + $0x230] sm:$0xff]  ;;  %v409_v22 = vperm.slane %v404_v20, 1  ;;  %v408_v26 = vperm.slane %v404_v20, 0 }
  0x3a   : > { %524 = vmatpush.bf16.msrb.mxu2 %v510_v32  ;;  %v472_v17 = vld [vmem:[#allocation2 + $0x210] sm:$0xff] }
  0x3b   : > { %443 = vmatpush.bf16.msrb.mxu0 %v380_v33  ;;  %v517_v33 = vpack.c.bf16 %v499_v31, %v498_v30 }
  0x3c   : > { %457 = vmatpush.bf16.msrb.mxu1 %v396_v34  ;;  %538 = vmatpush.bf16.msrb.mxu3 %v518_v28  ;;  %v496_v34 = vld [vmem:[#allocation2 + $0x390] sm:$0xff] }
  0x3d   : > { %v516_v36 = vpack.c.bf16 %v497_v35, %v496_v34 }
  0x3f   : > { %444 = vmatpush.bf16.msrb.mxu0 %v378_v43 }
  0x40   : > { %458 = vmatpush.bf16.msrb.mxu1 %v394_v46  ;;  %539 = vmatpush.bf16.msrb.mxu3 %v517_v33 }
  0x43   : > { %445 = vmatpush.bf16.msrb.mxu0 %v376_v55  ;;  %v483_v55 = vld [vmem:[#allocation2 + $0x2c0] sm:$0xff] }
  0x44   : > { %459 = vmatpush.bf16.msrb.mxu1 %v392_v58  ;;  %540 = vmatpush.bf16.msrb.mxu3 %v516_v36  ;;  %v509_v56 = vpack.c.bf16 %v483_v55, %v482_v54  ;;  %v495_v58 = vld [vmem:[#allocation2 + $0x380] sm:$0xff] }
  0x45   : > { %v515_v59 = vpack.c.bf16 %v495_v58, %v494_v57 }
  0x46   : > { %525 = vmatpush.bf16.msrb.mxu2 %v509_v56 }
  0x47   : > { %446 = vmatpush.bf16.msrb.mxu0 %v374_v3  ;;  %v479_v3 = vld [vmem:[#allocation2 + $0x280] sm:$0xff] }
  0x48   : > { %460 = vmatpush.bf16.msrb.mxu1 %v390_v6  ;;  %541 = vmatpush.bf16.msrb.mxu3 %v515_v59  ;;  %v507_v4 = vpack.c.bf16 %v479_v3, %v478_v2  ;;  %v491_v6 = vld [vmem:[#allocation2 + $0x340] sm:$0xff] }
  0x49   : > { %v513_v7 = vpack.c.bf16 %v491_v6, %v490_v5 }
  0x4a   : > { %526 = vmatpush.bf16.msrb.mxu2 %v508_v62 }
  0x4b   : > { %447 = vmatpush.bf16.msrb.mxu0 %v372_v15  ;;  %v475_v15 = vld [vmem:[#allocation2 + $0x240] sm:$0xff] }
  0x4c   : > { %461 = vmatpush.bf16.msrb.mxu1 %v388_v18  ;;  %542 = vmatpush.bf16.msrb.mxu3 %v514_v1  ;;  %v505_v16 = vpack.c.bf16 %v475_v15, %v474_v14  ;;  %v473_v18 = vld [vmem:[#allocation2 + $0x220] sm:$0xff] }
  0x4d   : > { %v504_v19 = vpack.c.bf16 %v473_v18, %v472_v17 }
  0x4e   : > { %527 = vmatpush.bf16.msrb.mxu2 %v507_v4 }
  0x50   : > { %543 = vmatpush.bf16.msrb.mxu3 %v513_v7 }
  0x52   : > { %528 = vmatpush.bf16.msrb.mxu2 %v506_v10 }
  0x54   : > { %544 = vmatpush.bf16.msrb.mxu3 %v512_v13 }
  0x56   : > { %529 = vmatpush.bf16.msrb.mxu2 %v505_v16 }
  0x5a   : > { %530 = vmatpush.bf16.msrb.mxu2 %v504_v19 }
  0xab   : > { %v284_v38 = vpop.f32.mrf.mxu0 }
  0xac   : > { %v298_v39 = vpop.f32.mrf.mxu1  ;;  %v285_v42 = vadd.f32 %v284_v38, %v271_v40 }
  0xad   : > { %v299_v43 = vadd.f32 %v298_v39, %v272_v41 }
  0xae   : > { %v303_v48 = vmax.f32 %v285_v42, 0.0 }
  0xaf   : > { %v304_v50 = vmax.f32 %v299_v43, 0.0 }
  0xb3   : > { %v286_v44 = vpop.f32.mrf.mxu0 }
  0xb4   : > { %v287_v45 = vadd.f32 %v286_v44, %v271_v40  ;;  %v300_v46 = vpop.f32.mrf.mxu1 }
  0xb5   : > { %v301_v47 = vadd.f32 %v300_v46, %v272_v41 }
  0xb6   : > { %v305_v49 = vmax.f32 %v287_v45, 0.0  ;;  %v520_v45 = vld [vmem:[#allocation2 + $0x410] ss:$0 sm:$0xff] }
  0xb7   : > { %v306_v51 = vmax.f32 %v301_v47, 0.0 }
  0xb8   : > { %v405_v52 = vpack.c.bf16 %v305_v49, %v303_v48 }
  0xb9   : > { %v406_v53 = vpack.c.bf16 %v306_v51, %v304_v50 }
  0xba   : > { %420 = vmatmul.bf16.vlgmr.msra.gmra.mxu2 %v405_v52  ;;  %448 = vmatmul.bf16.vlgmr.msrb.gmra.mxu0 %v405_v52 }
  0xbb   : > { %434 = vmatmul.bf16.vlgmr.msra.gmra.mxu3 %v406_v53  ;;  %462 = vmatmul.bf16.vlgmr.msrb.gmra.mxu1 %v406_v53 }
 0x137   : > { %v449_v21 = vpop.f32.mrf.mxu0 }
 0x138   : > { %v463_v23 = vpop.f32.mrf.mxu1  ;;  %v450_v24 = vadd.f32 %v449_v21, %v409_v22 }
 0x13a   : > { %v464_v29 = vadd.f32 %v463_v23, %v450_v24 }
 0x13c   : > { %v469_v34 = vmax.f32 %v464_v29, 0.0 }
 0x13d   : > { %v421_v25 = vpop.f32.mrf.mxu2 }
 0x13e   : > { %v435_v27 = vpop.f32.mrf.mxu3  ;;  %v422_v32 = vadd.f32 %v421_v25, %v408_v26 }
 0x13f   : > { %v451_v28 = vpop.f32.mrf.mxu0 }
 0x140   : > { %v452_v30 = vadd.f32 %v451_v28, %v409_v22  ;;  %v465_v31 = vpop.f32.mrf.mxu1  ;;  %v436_v37 = vadd.f32 %v435_v27, %v422_v32 }
 0x142   : > { %v466_v33 = vadd.f32 %v465_v31, %v452_v30  ;;  %v468_v42 = vmax.f32 %v436_v37, 0.0 }
 0x144   : > { %v471_v35 = vmax.f32 %v466_v33, 0.0 }
 0x145   : > { %v423_v36 = vpop.f32.mrf.mxu2 }
 0x146   : > { %v522_v38 = vpack.c.bf16 %v471_v35, %v469_v34  ;;  %v424_v39 = vadd.f32 %v423_v36, %v408_v26  ;;  %v437_v40 = vpop.f32.mrf.mxu3 }
 0x148   : > { %v438_v41 = vadd.f32 %v437_v40, %v424_v39  ;;  %545 = vmatmul.bf16.vlgmr.msrb.gmra.mxu3 %v522_v38 }
 0x14a   : > { %v470_v43 = vmax.f32 %v438_v41, 0.0 }
 0x14c   : > { %v521_v44 = vpack.c.bf16 %v470_v43, %v468_v42 }
 0x14e   : > { %531 = vmatmul.bf16.vlgmr.msrb.gmra.mxu2 %v521_v44 }
 0x1cb   : > { %v546_v46 = vpop.f32.mrf.mxu3 }
 0x1d1   : > { %v532_v47 = vpop.f32.mrf.mxu2 }
 0x1d2   : > { %v533_v48 = vadd.f32 %v532_v47, %v520_v45 }
 0x1d3   : > { %v548_v52 = vpop.f32.mrf.mxu3 }
 0x1d4   : > { %v547_v49 = vadd.f32 %v546_v46, %v533_v48 }
 0x1d6   : > { %552 = vst.msk [vmem:[%s216_s24] sm:$0xff] %vm551_vm0, %v547_v49 }
 0x1d9   : > { %v534_v50 = vpop.f32.mrf.mxu2 }
 0x1da   : > { %v535_v51 = vadd.f32 %v534_v50, %v520_v45 }
 0x1dc   : > { %v549_v53 = vadd.f32 %v548_v52, %v535_v51 }
 0x1de   : > { %553 = vst.msk [vmem:[%s216_s24 + $0x8] sm:$0xff] %vm551_vm0, %v549_v53 }
 0x1df PF: > { %s15_s15 = sadd.s32 1, %s696_s15  }
 0x1e0   : > { %p12_p7 = scmp.ge.s32.totalorder %s15_s15, 4  }
 0x1e2   :  { %14 = sbr.rel (!%p12_p7) target bundleno = 1 (0x1), region = 72 }
 0x1e7   :  { %576 = vsyncpa [#allocation3], 1 }
 0x1e8   :  { %578 = vsyncpa [#allocation3 + $0x1], 1 }

</bundles_post_ra>
